<compile_context>
chip_gen: v5e
topology: v5e:2x2
jax: 0.10.0
libtpu: 0.0.40
codegen_flags: <defaults>
</compile_context>

<pallas_src>
import jax
import jax.numpy as jnp
from jax.experimental import pallas as pl
from jax.experimental.pallas import tpu as pltpu

TEMPERATURE = 0.07
INV_TEMP = 1.0 / TEMPERATURE
COS_EPS = 1e-8  # torch.nn.CosineSimilarity default eps (clamped per-norm)


def _supcon_kernel(img_ref, labc_ref, txt_ref, labr_ref, out_ref,
                   m0_ref, l0_ref, cnt_ref, s_ref, a1_ref):
    t = pl.program_id(0)
    n_t = pl.num_programs(0)
    tq = img_ref.shape[0]          # row-tile size (padded image rows possible)
    b = txt_ref.shape[0]           # real batch size (static)

    @pl.when(t == 0)
    def _init():
        m0_ref[...] = jnp.full_like(m0_ref, -jnp.inf)
        l0_ref[...] = jnp.zeros_like(l0_ref)
        cnt_ref[...] = jnp.zeros_like(cnt_ref)
        s_ref[...] = jnp.zeros_like(s_ref)
        a1_ref[...] = jnp.zeros_like(a1_ref)

    img = img_ref[...]             # (TQ, D) f32, padded rows are zero
    txt = txt_ref[...]             # (B, D)  f32
    lab_c = labc_ref[...]          # (TQ, 1) int32
    lab_r = labr_ref[...]          # (1, B)  int32

    # Cosine normalization; fold 1/temperature into the image side.
    img_nrm = jnp.sqrt(jnp.sum(img * img, axis=-1, keepdims=True))     # (TQ,1)
    txt_nrm = jnp.sqrt(jnp.sum(txt * txt, axis=-1, keepdims=True))     # (B,1)
    img_s = img * (INV_TEMP / jnp.maximum(img_nrm, COS_EPS))           # (TQ,D)
    txt_n = txt / jnp.maximum(txt_nrm, COS_EPS)                        # (B,D)

    # (TQ, B) logits tile on the MXU without transposing txt_n.
    logits = jax.lax.dot_general(
        img_s, txt_n, (((1,), (1,)), ((), ())),
        preferred_element_type=jnp.float32)

    # Valid-row mask (handles the zero-padded tail tile).
    row_idx = t * tq + jax.lax.broadcasted_iota(jnp.int32, (tq, 1), 0)
    valid = row_idx < b                                                # (TQ,1)

    # Positive-pair mask (labels[i] == labels[j]) restricted to valid rows.
    pos = jnp.logical_and(lab_c == lab_r, valid).astype(jnp.float32)   # (TQ,B)

    # S += sum(mask * logits)
    s_ref[...] += jnp.sum(pos * logits, keepdims=True)                 # (1,1)

    # Row-direction (axis=1) LSE — full row is available in this tile.
    m1 = jnp.max(logits, axis=1, keepdims=True)                        # (TQ,1)
    lse1 = m1 + jnp.log(jnp.sum(jnp.exp(logits - m1), axis=1, keepdims=True))
    cnt_row = jnp.sum(pos, axis=1, keepdims=True)                      # (TQ,1)
    a1_ref[...] += jnp.sum(cnt_row * lse1, keepdims=True)              # (1,1)

    # Column-direction: accumulate per-column positive counts and online LSE.
    cnt_ref[...] += jnp.sum(pos, axis=0, keepdims=True)                # (1,B)

    lc = jnp.where(valid, logits, -jnp.inf)                            # (TQ,B)
    m_new = jnp.maximum(m0_ref[...], jnp.max(lc, axis=0, keepdims=True))
    l0_ref[...] = (l0_ref[...] * jnp.exp(m0_ref[...] - m_new)
                   + jnp.sum(jnp.exp(lc - m_new), axis=0, keepdims=True))
    m0_ref[...] = m_new

    @pl.when(t == n_t - 1)
    def _finalize():
        lse0 = m0_ref[...] + jnp.log(l0_ref[...])                      # (1,B)
        a0 = jnp.sum(cnt_ref[...] * lse0, keepdims=True)               # (1,1)
        inv_b = 1.0 / b
        s = s_ref[...]
        img2text = -(s - a1_ref[...]) * inv_b
        text2img = -(s - a0) * inv_b
        out_ref[...] = 0.5 * (img2text + text2img)


def symmetric_supcon_loss(img_emb, text_emb, labels, *, row_tile=256):
    """img_emb, text_emb: (B, D) float; labels: (B,) int -> scalar f32 loss."""
    B, D = img_emb.shape
    img = img_emb.astype(jnp.float32)
    txt = text_emb.astype(jnp.float32)
    lab = labels.astype(jnp.int32)

    # Row-tile size: multiple of 8 sublanes, no larger than needed.
    tq = min(-(-B // 8) * 8, -(-row_tile // 8) * 8)
    num_tiles = -(-B // tq)
    bp = num_tiles * tq
    pad = bp - B
    if pad:
        img = jnp.pad(img, ((0, pad), (0, 0)))
        lab_col = jnp.pad(lab, (0, pad)).reshape(bp, 1)
    else:
        lab_col = lab.reshape(bp, 1)
    lab_row = lab.reshape(1, B)

    grid_spec = pltpu.PrefetchScalarGridSpec(
        num_scalar_prefetch=0,
        grid=(num_tiles,),
        in_specs=[
            pl.BlockSpec((tq, D), lambda t: (t, 0)),   # image row tile
            pl.BlockSpec((tq, 1), lambda t: (t, 0)),   # labels (column layout)
            pl.BlockSpec((B, D), lambda t: (0, 0)),    # full text emb (resident)
            pl.BlockSpec((1, B), lambda t: (0, 0)),    # labels (row layout)
        ],
        out_specs=pl.BlockSpec((1, 1), lambda t: (0, 0)),
        scratch_shapes=[
            pltpu.VMEM((1, B), jnp.float32),   # online column max
            pltpu.VMEM((1, B), jnp.float32),   # online column sum-exp
            pltpu.VMEM((1, B), jnp.float32),   # per-column positive counts
            pltpu.VMEM((1, 1), jnp.float32),   # S  = sum(mask * logits)
            pltpu.VMEM((1, 1), jnp.float32),   # A1 = sum_i cnt_i * lse1_i
        ],
    )

    out = pl.pallas_call(
        _supcon_kernel,
        out_shape=jax.ShapeDtypeStruct((1, 1), jnp.float32),
        grid_spec=grid_spec,
        compiler_params=pltpu.CompilerParams(
            dimension_semantics=("arbitrary",)),   # column LSE accumulates across row tiles
    )(img, lab_col, txt, lab_row)
    return out[0, 0]


def _reference(img_emb, text_emb, labels):
    # Pure-JAX reference mirroring the PyTorch module.
    img_n = img_emb / jnp.maximum(
        jnp.linalg.norm(img_emb, axis=-1, keepdims=True), COS_EPS)
    txt_n = text_emb / jnp.maximum(
        jnp.linalg.norm(text_emb, axis=-1, keepdims=True), COS_EPS)
    logits = (img_n @ txt_n.T) / TEMPERATURE
    mask = (labels[:, None] == labels[None, :]).astype(jnp.float32)
    ls1 = jax.nn.log_softmax(logits, axis=1)
    ls0 = jax.nn.log_softmax(logits, axis=0)
    i2t = -(mask * ls1).sum(1).mean()
    t2i = -(mask * ls0).sum(0).mean()
    return (i2t + t2i) / 2


if __name__ == "__main__":
    key = jax.random.PRNGKey(0)
    k1, k2, k3 = jax.random.split(key, 3)

    B, D = 8, 32
    img_emb = jax.random.normal(k1, (B, D), dtype=jnp.float32)
    text_emb = jax.random.normal(k2, (B, D), dtype=jnp.float32)
    labels = jax.random.randint(k3, (B,), 0, 4, dtype=jnp.int32)

    loss = symmetric_supcon_loss(img_emb, text_emb, labels)
    jax.block_until_ready(loss)

    ref = _reference(img_emb, text_emb, labels)
    assert jnp.allclose(loss, ref, rtol=1e-5, atol=1e-5), (loss, ref)

    print("KERNEL_OK")
</pallas_src>

<mosaic_0001>
module attributes {stable_mosaic.version = 11 : i64} {
  func.func @_supcon_kernel(%arg0: i32, %arg1: memref<8x32xf32, #tpu.memory_space<vmem>>, %arg2: memref<8x1xi32, #tpu.memory_space<vmem>>, %arg3: memref<8x32xf32, #tpu.memory_space<vmem>>, %arg4: memref<1x8xi32, #tpu.memory_space<vmem>>, %arg5: memref<1x1xf32, #tpu.memory_space<vmem>>, %arg6: memref<1x8xf32, #tpu.memory_space<vmem>>, %arg7: memref<1x8xf32, #tpu.memory_space<vmem>>, %arg8: memref<1x8xf32, #tpu.memory_space<vmem>>, %arg9: memref<1x1xf32, #tpu.memory_space<vmem>>, %arg10: memref<1x1xf32, #tpu.memory_space<vmem>>) attributes {dimension_semantics = [#tpu.dimension_semantics<arbitrary>], iteration_bounds = array<i64: 1>, scalar_prefetch = 0 : i64, scratch_operands = 5 : i64, tpu.core_type = #tpu.core_type<tc>, window_params = [{transform_indices = @transform_0, window_bounds = array<i64: 8, 32>}, {transform_indices = @transform_1, window_bounds = array<i64: 8, 1>}, {pipeline_mode = #tpu.pipeline_mode<synchronous>, transform_indices = @transform_2, window_bounds = array<i64: 8, 32>}, {pipeline_mode = #tpu.pipeline_mode<synchronous>, transform_indices = @transform_3, window_bounds = array<i64: 1, 8>}, {pipeline_mode = #tpu.pipeline_mode<synchronous>, transform_indices = @transform_4, window_bounds = array<i64: 1, 1>}]} {
    %c0_i32 = arith.constant 0 : i32
    %0 = arith.cmpi eq, %arg0, %c0_i32 : i32
    %1 = arith.extui %0 : i1 to i32
    %c0_i32_0 = arith.constant 0 : i32
    %2 = arith.cmpi ne, %1, %c0_i32_0 : i32
    scf.if %2 {
      %cst_47 = arith.constant 0xFF800000 : f32
      %97 = vector.broadcast %cst_47 : f32 to vector<1x8xf32>
      %c0_48 = arith.constant 0 : index
      %c0_49 = arith.constant 0 : index
      %98 = vector.load %arg6[%c0_48, %c0_49] : memref<1x8xf32, #tpu.memory_space<vmem>>, vector<1x8xf32>
      tpu.vector_store %arg6[%c0_48, %c0_49], %97 {strides = array<i32>} : memref<1x8xf32, #tpu.memory_space<vmem>>, vector<1x8xf32>,
      %cst_50 = arith.constant 0.000000e+00 : f32
      %99 = vector.broadcast %cst_50 : f32 to vector<1x8xf32>
      %c0_51 = arith.constant 0 : index
      %c0_52 = arith.constant 0 : index
      %100 = vector.load %arg7[%c0_51, %c0_52] : memref<1x8xf32, #tpu.memory_space<vmem>>, vector<1x8xf32>
      tpu.vector_store %arg7[%c0_51, %c0_52], %99 {strides = array<i32>} : memref<1x8xf32, #tpu.memory_space<vmem>>, vector<1x8xf32>,
      %cst_53 = arith.constant 0.000000e+00 : f32
      %101 = vector.broadcast %cst_53 : f32 to vector<1x8xf32>
      %c0_54 = arith.constant 0 : index
      %c0_55 = arith.constant 0 : index
      %102 = vector.load %arg8[%c0_54, %c0_55] : memref<1x8xf32, #tpu.memory_space<vmem>>, vector<1x8xf32>
      tpu.vector_store %arg8[%c0_54, %c0_55], %101 {strides = array<i32>} : memref<1x8xf32, #tpu.memory_space<vmem>>, vector<1x8xf32>,
      %cst_56 = arith.constant 0.000000e+00 : f32
      %103 = vector.broadcast %cst_56 : f32 to vector<1x1xf32>
      %c0_57 = arith.constant 0 : index
      %c0_58 = arith.constant 0 : index
      %104 = vector.load %arg9[%c0_57, %c0_58] : memref<1x1xf32, #tpu.memory_space<vmem>>, vector<1x1xf32>
      tpu.vector_store %arg9[%c0_57, %c0_58], %103 {strides = array<i32>} : memref<1x1xf32, #tpu.memory_space<vmem>>, vector<1x1xf32>,
      %cst_59 = arith.constant 0.000000e+00 : f32
      %105 = vector.broadcast %cst_59 : f32 to vector<1x1xf32>
      %c0_60 = arith.constant 0 : index
      %c0_61 = arith.constant 0 : index
      %106 = vector.load %arg10[%c0_60, %c0_61] : memref<1x1xf32, #tpu.memory_space<vmem>>, vector<1x1xf32>
      tpu.vector_store %arg10[%c0_60, %c0_61], %105 {strides = array<i32>} : memref<1x1xf32, #tpu.memory_space<vmem>>, vector<1x1xf32>,
    } else {
    }
    %c0 = arith.constant 0 : index
    %c0_1 = arith.constant 0 : index
    %3 = vector.load %arg1[%c0, %c0_1] : memref<8x32xf32, #tpu.memory_space<vmem>>, vector<8x32xf32>
    %c0_2 = arith.constant 0 : index
    %c0_3 = arith.constant 0 : index
    %4 = vector.load %arg3[%c0_2, %c0_3] : memref<8x32xf32, #tpu.memory_space<vmem>>, vector<8x32xf32>
    %c0_4 = arith.constant 0 : index
    %c0_5 = arith.constant 0 : index
    %5 = vector.load %arg2[%c0_4, %c0_5] : memref<8x1xi32, #tpu.memory_space<vmem>>, vector<8x1xi32>
    %c0_6 = arith.constant 0 : index
    %c0_7 = arith.constant 0 : index
    %6 = vector.load %arg4[%c0_6, %c0_7] : memref<1x8xi32, #tpu.memory_space<vmem>>, vector<1x8xi32>
    %7 = arith.mulf %3, %3 : vector<8x32xf32>
    %cst = arith.constant dense<0.000000e+00> : vector<8xf32>
    %8 = vector.multi_reduction <add>, %7, %cst [1] : vector<8x32xf32> to vector<8xf32>
    %9 = vector.shape_cast %8 : vector<8xf32> to vector<8x1xf32>
    %10 = math.sqrt %9 : vector<8x1xf32>
    %11 = arith.mulf %4, %4 : vector<8x32xf32>
    %cst_8 = arith.constant dense<0.000000e+00> : vector<8xf32>
    %12 = vector.multi_reduction <add>, %11, %cst_8 [1] : vector<8x32xf32> to vector<8xf32>
    %13 = vector.shape_cast %12 : vector<8xf32> to vector<8x1xf32>
    %14 = math.sqrt %13 : vector<8x1xf32>
    %cst_9 = arith.constant 9.99999993E-9 : f32
    %15 = vector.broadcast %cst_9 : f32 to vector<8x1xf32>
    %16 = arith.maximumf %10, %15 : vector<8x1xf32>
    %cst_10 = arith.constant 14.2857141 : f32
    %17 = vector.broadcast %cst_10 : f32 to vector<8x1xf32>
    %18 = arith.divf %17, %16 : vector<8x1xf32>
    %19 = vector.broadcast %18 : vector<8x1xf32> to vector<8x32xf32>
    %20 = arith.mulf %3, %19 : vector<8x32xf32>
    %cst_11 = arith.constant 9.99999993E-9 : f32
    %21 = vector.broadcast %cst_11 : f32 to vector<8x1xf32>
    %22 = arith.maximumf %14, %21 : vector<8x1xf32>
    %23 = vector.broadcast %22 : vector<8x1xf32> to vector<8x32xf32>
    %24 = arith.divf %4, %23 : vector<8x32xf32>
    %cst_12 = arith.constant dense<0.000000e+00> : vector<8x8xf32>
    %25 = tpu.matmul %20, %24, %cst_12 {dimension_numbers = #tpu.dot_dimension_numbers<[1], [1], [0], [0], [0, 0, 1, 0], [], []>} : vector<8x32xf32>, vector<8x32xf32>, vector<8x8xf32> -> vector<8x8xf32>
    %c8_i32 = arith.constant 8 : i32
    %26 = arith.muli %arg0, %c8_i32 : i32
    %27 = tpu.iota {dimensions = array<i32: 0>} : vector<8x1xi32>
    %28 = vector.broadcast %26 : i32 to vector<8x1xi32>
    %29 = arith.addi %28, %27 : vector<8x1xi32>
    %c8_i32_13 = arith.constant 8 : i32
    %30 = vector.broadcast %c8_i32_13 : i32 to vector<8x1xi32>
    %31 = arith.cmpi slt, %29, %30 : vector<8x1xi32>
    %32 = vector.broadcast %5 : vector<8x1xi32> to vector<8x8xi32>
    %33 = vector.broadcast %6 : vector<1x8xi32> to vector<8x8xi32>
    %34 = arith.cmpi eq, %32, %33 : vector<8x8xi32>
    %35 = vector.broadcast %31 : vector<8x1xi1> to vector<8x8xi1>
    %36 = arith.andi %34, %35 : vector<8x8xi1>
    %37 = arith.extui %36 : vector<8x8xi1> to vector<8x8xi32>
    %38 = arith.sitofp %37 : vector<8x8xi32> to vector<8x8xf32>
    %c0_14 = arith.constant 0 : index
    %c0_15 = arith.constant 0 : index
    %39 = vector.load %arg9[%c0_14, %c0_15] : memref<1x1xf32, #tpu.memory_space<vmem>>, vector<1x1xf32>
    %40 = arith.mulf %38, %25 : vector<8x8xf32>
    %41 = vector.shape_cast %40 : vector<8x8xf32> to vector<1x8x8xf32>
    %cst_16 = arith.constant dense<0.000000e+00> : vector<1xf32>
    %42 = vector.multi_reduction <add>, %41, %cst_16 [1, 2] : vector<1x8x8xf32> to vector<1xf32>
    %43 = vector.shape_cast %42 : vector<1xf32> to vector<1x1x1xf32>
    %44 = vector.extract %43[0, 0, 0] : f32 from vector<1x1x1xf32>
    %45 = vector.broadcast %44 : f32 to vector<1x1xf32>
    %46 = arith.addf %39, %45 : vector<1x1xf32>
    %c0_17 = arith.constant 0 : index
    %c0_18 = arith.constant 0 : index
    %47 = vector.load %arg9[%c0_17, %c0_18] : memref<1x1xf32, #tpu.memory_space<vmem>>, vector<1x1xf32>
    tpu.vector_store %arg9[%c0_17, %c0_18], %46 {strides = array<i32>} : memref<1x1xf32, #tpu.memory_space<vmem>>, vector<1x1xf32>,
    %cst_19 = arith.constant dense<0xFF800000> : vector<8xf32>
    %48 = vector.multi_reduction <maximumf>, %25, %cst_19 [1] : vector<8x8xf32> to vector<8xf32>
    %49 = vector.shape_cast %48 : vector<8xf32> to vector<8x1xf32>
    %50 = vector.broadcast %49 : vector<8x1xf32> to vector<8x8xf32>
    %51 = arith.subf %25, %50 : vector<8x8xf32>
    %52 = math.exp %51 : vector<8x8xf32>
    %cst_20 = arith.constant dense<0.000000e+00> : vector<8xf32>
    %53 = vector.multi_reduction <add>, %52, %cst_20 [1] : vector<8x8xf32> to vector<8xf32>
    %54 = vector.shape_cast %53 : vector<8xf32> to vector<8x1xf32>
    %55 = math.log %54 : vector<8x1xf32>
    %56 = arith.addf %49, %55 : vector<8x1xf32>
    %cst_21 = arith.constant dense<0.000000e+00> : vector<8xf32>
    %57 = vector.multi_reduction <add>, %38, %cst_21 [1] : vector<8x8xf32> to vector<8xf32>
    %58 = vector.shape_cast %57 : vector<8xf32> to vector<8x1xf32>
    %c0_22 = arith.constant 0 : index
    %c0_23 = arith.constant 0 : index
    %59 = vector.load %arg10[%c0_22, %c0_23] : memref<1x1xf32, #tpu.memory_space<vmem>>, vector<1x1xf32>
    %60 = arith.mulf %58, %56 : vector<8x1xf32>
    %61 = vector.shape_cast %60 : vector<8x1xf32> to vector<1x8x1xf32>
    %cst_24 = arith.constant dense<0.000000e+00> : vector<1xf32>
    %62 = vector.multi_reduction <add>, %61, %cst_24 [1, 2] : vector<1x8x1xf32> to vector<1xf32>
    %63 = vector.shape_cast %62 : vector<1xf32> to vector<1x1x1xf32>
    %64 = vector.extract %63[0, 0, 0] : f32 from vector<1x1x1xf32>
    %65 = vector.broadcast %64 : f32 to vector<1x1xf32>
    %66 = arith.addf %59, %65 : vector<1x1xf32>
    %c0_25 = arith.constant 0 : index
    %c0_26 = arith.constant 0 : index
    %67 = vector.load %arg10[%c0_25, %c0_26] : memref<1x1xf32, #tpu.memory_space<vmem>>, vector<1x1xf32>
    tpu.vector_store %arg10[%c0_25, %c0_26], %66 {strides = array<i32>} : memref<1x1xf32, #tpu.memory_space<vmem>>, vector<1x1xf32>,
    %c0_27 = arith.constant 0 : index
    %c0_28 = arith.constant 0 : index
    %68 = vector.load %arg8[%c0_27, %c0_28] : memref<1x8xf32, #tpu.memory_space<vmem>>, vector<1x8xf32>
    %cst_29 = arith.constant dense<0.000000e+00> : vector<8xf32>
    %69 = vector.multi_reduction <add>, %38, %cst_29 [0] : vector<8x8xf32> to vector<8xf32>
    %70 = vector.shape_cast %69 : vector<8xf32> to vector<1x8xf32>
    %71 = arith.addf %68, %70 : vector<1x8xf32>
    %c0_30 = arith.constant 0 : index
    %c0_31 = arith.constant 0 : index
    %72 = vector.load %arg8[%c0_30, %c0_31] : memref<1x8xf32, #tpu.memory_space<vmem>>, vector<1x8xf32>
    tpu.vector_store %arg8[%c0_30, %c0_31], %71 {strides = array<i32>} : memref<1x8xf32, #tpu.memory_space<vmem>>, vector<1x8xf32>,
    %cst_32 = arith.constant 0xFF800000 : f32
    %73 = vector.shape_cast %31 : vector<8x1xi1> to vector<8x1xi1>
    %74 = vector.broadcast %73 : vector<8x1xi1> to vector<8x8xi1>
    %75 = vector.broadcast %cst_32 : f32 to vector<8x8xf32>
    %76 = arith.select %74, %25, %75 : vector<8x8xi1>, vector<8x8xf32>
    %c0_33 = arith.constant 0 : index
    %c0_34 = arith.constant 0 : index
    %77 = vector.load %arg6[%c0_33, %c0_34] : memref<1x8xf32, #tpu.memory_space<vmem>>, vector<1x8xf32>
    %cst_35 = arith.constant dense<0xFF800000> : vector<8xf32>
    %78 = vector.multi_reduction <maximumf>, %76, %cst_35 [0] : vector<8x8xf32> to vector<8xf32>
    %79 = vector.shape_cast %78 : vector<8xf32> to vector<1x8xf32>
    %80 = arith.maximumf %77, %79 : vector<1x8xf32>
    %c0_36 = arith.constant 0 : index
    %c0_37 = arith.constant 0 : index
    %81 = vector.load %arg7[%c0_36, %c0_37] : memref<1x8xf32, #tpu.memory_space<vmem>>, vector<1x8xf32>
    %c0_38 = arith.constant 0 : index
    %c0_39 = arith.constant 0 : index
    %82 = vector.load %arg6[%c0_38, %c0_39] : memref<1x8xf32, #tpu.memory_space<vmem>>, vector<1x8xf32>
    %83 = arith.subf %82, %80 : vector<1x8xf32>
    %84 = math.exp %83 : vector<1x8xf32>
    %85 = arith.mulf %81, %84 : vector<1x8xf32>
    %86 = vector.broadcast %80 : vector<1x8xf32> to vector<8x8xf32>
    %87 = arith.subf %76, %86 : vector<8x8xf32>
    %88 = math.exp %87 : vector<8x8xf32>
    %cst_40 = arith.constant dense<0.000000e+00> : vector<8xf32>
    %89 = vector.multi_reduction <add>, %88, %cst_40 [0] : vector<8x8xf32> to vector<8xf32>
    %90 = vector.shape_cast %89 : vector<8xf32> to vector<1x8xf32>
    %91 = arith.addf %85, %90 : vector<1x8xf32>
    %c0_41 = arith.constant 0 : index
    %c0_42 = arith.constant 0 : index
    %92 = vector.load %arg7[%c0_41, %c0_42] : memref<1x8xf32, #tpu.memory_space<vmem>>, vector<1x8xf32>
    tpu.vector_store %arg7[%c0_41, %c0_42], %91 {strides = array<i32>} : memref<1x8xf32, #tpu.memory_space<vmem>>, vector<1x8xf32>,
    %c0_43 = arith.constant 0 : index
    %c0_44 = arith.constant 0 : index
    %93 = vector.load %arg6[%c0_43, %c0_44] : memref<1x8xf32, #tpu.memory_space<vmem>>, vector<1x8xf32>
    tpu.vector_store %arg6[%c0_43, %c0_44], %80 {strides = array<i32>} : memref<1x8xf32, #tpu.memory_space<vmem>>, vector<1x8xf32>,
    %c0_i32_45 = arith.constant 0 : i32
    %94 = arith.cmpi eq, %arg0, %c0_i32_45 : i32
    %95 = arith.extui %94 : i1 to i32
    %c0_i32_46 = arith.constant 0 : i32
    %96 = arith.cmpi ne, %95, %c0_i32_46 : i32
    scf.if %96 {
      %c0_47 = arith.constant 0 : index
      %c0_48 = arith.constant 0 : index
      %97 = vector.load %arg6[%c0_47, %c0_48] : memref<1x8xf32, #tpu.memory_space<vmem>>, vector<1x8xf32>
      %c0_49 = arith.constant 0 : index
      %c0_50 = arith.constant 0 : index
      %98 = vector.load %arg7[%c0_49, %c0_50] : memref<1x8xf32, #tpu.memory_space<vmem>>, vector<1x8xf32>
      %99 = math.log %98 : vector<1x8xf32>
      %100 = arith.addf %97, %99 : vector<1x8xf32>
      %c0_51 = arith.constant 0 : index
      %c0_52 = arith.constant 0 : index
      %101 = vector.load %arg8[%c0_51, %c0_52] : memref<1x8xf32, #tpu.memory_space<vmem>>, vector<1x8xf32>
      %102 = arith.mulf %101, %100 : vector<1x8xf32>
      %103 = vector.shape_cast %102 : vector<1x8xf32> to vector<1x1x8xf32>
      %cst_53 = arith.constant dense<0.000000e+00> : vector<1xf32>
      %104 = vector.multi_reduction <add>, %103, %cst_53 [1, 2] : vector<1x1x8xf32> to vector<1xf32>
      %105 = vector.shape_cast %104 : vector<1xf32> to vector<1x1x1xf32>
      %106 = vector.extract %105[0, 0, 0] : f32 from vector<1x1x1xf32>
      %107 = vector.broadcast %106 : f32 to vector<1x1xf32>
      %c0_54 = arith.constant 0 : index
      %c0_55 = arith.constant 0 : index
      %108 = vector.load %arg9[%c0_54, %c0_55] : memref<1x1xf32, #tpu.memory_space<vmem>>, vector<1x1xf32>
      %c0_56 = arith.constant 0 : index
      %c0_57 = arith.constant 0 : index
      %109 = vector.load %arg10[%c0_56, %c0_57] : memref<1x1xf32, #tpu.memory_space<vmem>>, vector<1x1xf32>
      %110 = arith.subf %108, %109 : vector<1x1xf32>
      %cst_58 = arith.constant 0.000000e+00 : f32
      %111 = vector.broadcast %cst_58 : f32 to vector<1x1xf32>
      %112 = arith.subf %111, %110 : vector<1x1xf32>
      %cst_59 = arith.constant 1.250000e-01 : f32
      %113 = vector.broadcast %cst_59 : f32 to vector<1x1xf32>
      %114 = arith.mulf %112, %113 : vector<1x1xf32>
      %115 = arith.subf %108, %107 : vector<1x1xf32>
      %cst_60 = arith.constant 0.000000e+00 : f32
      %116 = vector.broadcast %cst_60 : f32 to vector<1x1xf32>
      %117 = arith.subf %116, %115 : vector<1x1xf32>
      %cst_61 = arith.constant 1.250000e-01 : f32
      %118 = vector.broadcast %cst_61 : f32 to vector<1x1xf32>
      %119 = arith.mulf %117, %118 : vector<1x1xf32>
      %120 = arith.addf %114, %119 : vector<1x1xf32>
      %cst_62 = arith.constant 5.000000e-01 : f32
      %121 = vector.broadcast %cst_62 : f32 to vector<1x1xf32>
      %122 = arith.mulf %121, %120 : vector<1x1xf32>
      %c0_63 = arith.constant 0 : index
      %c0_64 = arith.constant 0 : index
      %123 = vector.load %arg5[%c0_63, %c0_64] : memref<1x1xf32, #tpu.memory_space<vmem>>, vector<1x1xf32>
      tpu.vector_store %arg5[%c0_63, %c0_64], %122 {strides = array<i32>} : memref<1x1xf32, #tpu.memory_space<vmem>>, vector<1x1xf32>,
    } else {
    }
    return
  }
  func.func @transform_0(%arg0: i32) -> (i32, i32) {
    %c0_i32 = arith.constant 0 : i32
    %c0_i32_0 = arith.constant 0 : i32
    return %arg0, %c0_i32 : i32, i32
  }
  func.func @transform_1(%arg0: i32) -> (i32, i32) {
    %c0_i32 = arith.constant 0 : i32
    %c0_i32_0 = arith.constant 0 : i32
    return %arg0, %c0_i32 : i32, i32
  }
  func.func @transform_2(%arg0: i32) -> (i32, i32) {
    %c0_i32 = arith.constant 0 : i32
    %c0_i32_0 = arith.constant 0 : i32
    %c0_i32_1 = arith.constant 0 : i32
    return %c0_i32, %c0_i32_0 : i32, i32
  }
  func.func @transform_3(%arg0: i32) -> (i32, i32) {
    %c0_i32 = arith.constant 0 : i32
    %c0_i32_0 = arith.constant 0 : i32
    %c0_i32_1 = arith.constant 0 : i32
    return %c0_i32, %c0_i32_0 : i32, i32
  }
  func.func @transform_4(%arg0: i32) -> (i32, i32) {
    %c0_i32 = arith.constant 0 : i32
    %c0_i32_0 = arith.constant 0 : i32
    %c0_i32_1 = arith.constant 0 : i32
    return %c0_i32, %c0_i32_0 : i32, i32
  }
}

</mosaic_0001>

<bundles_post_ra>
// kernel: tpu_custom_call.1
= control target key start
LH: loop header
LB: loop body
LE: loop exit
PB: predicated region body
PF: predicated region fallthrough
CT: control target
= control target key end

     0   :  { %9 = vsyncpa [#allocation8], 0  ;;  %s456_s0 = inlined_call_operand.vmem [shape: f32[8,32], index: 0, kind: input, shape index: {}]   ;;  %s457_s1 = inlined_call_operand.vmem [shape: s32[8,1], index: 1, kind: input, shape index: {}]   ;;  %s458_s2 = inlined_call_operand.hbm [shape: f32[8,32], index: 2, kind: input, shape index: {}]   ;;  %s459_s3 = inlined_call_operand.vmem [shape: s32[1,8], index: 3, kind: input, shape index: {}]   ;;  %s460_s4 = inlined_call_operand.hbm [shape: f32[1,1], index: 4, kind: output, shape index: {}]  }
   0x1   :  { %10 = vsyncpa [#allocation9], 0  ;;  %s20_s17 = sshll.u32 %s458_s2, 4  ;;  %s380_s18 = smov [#allocation7]   ;;  %s21_s17 = int_to_ptr.hbm [resolvable:$true] %s20_s17 }
   0x2   :  { %s22_s19 = sshll.u32 %s380_s18, 4  ;;  %s23_s19 = int_to_ptr.vmem [resolvable:$true] %s22_s19 }
   0x3   :  { %25 = dma.hbm_to_vmem [thread:$0]  %s21_s17, 128, %s23_s19, [#allocation8]  }
   0x4   :  { %376 = dma.done.wait [#allocation8], 128  }
   0x5   :  { %377 = vsyncadd [#allocation8], 4294967168  ;;  %v44_v0 = vld [vmem:[#allocation7] sm:$0xff]  ;;  %vm48_vm0 = vcmask 261120   ;;  %vm36_vm13 = vcmask 57344   ;;  %v381_v53 = vmov -inf  }
   0x6   :  { %v64_v1 = vmul.f32 %v44_v0, %v44_v0  ;;  %v416_v2 = vld [vmem:[%s456_s0] sm:$0xff]  ;;  %37 = vst.msk [vmem:[#allocation2] sm:$0x1] %vm36_vm13, %v381_v53  ;;  %v382_v54 = vmov 0.0   ;;  %v383_v55 = vmov 0   ;;  %vm157_vm14 = vcmask 64512  }
   0x7   :  { %v47_v4 = vmul.f32 %v416_v2, %v416_v2  ;;  %38 = vst.msk [vmem:[#allocation3] sm:$0x1] %vm36_vm13, %v382_v54  ;;  %307 = vset.pattern.permute.xlu1 %v383_v55  ;;  %308 = vset.pattern.permute.xlu0 %v383_v55  ;;  %s384_s25 = smov [#allocation10]   ;;  %s283_s29 = sshll.u32 %s460_s4, 4  ;;  %s284_s29 = int_to_ptr.hbm [resolvable:$true] %s283_s29 }
   0x8   :  { %v65_v3 = vsel %vm48_vm0, %v64_v1, 0.0  ;;  %39 = vst.msk [vmem:[#allocation4] sm:$0x1] %vm36_vm13, %v382_v54  ;;  %s281_s26 = sshll.u32 %s384_s25, 4  ;;  %s282_s26 = int_to_ptr.vmem [resolvable:$true] %s281_s26 }
   0x9   :  { %66 = vadd.xlane.f32.xlu0 %v65_v3  ;;  %v49_v5 = vsel %vm48_vm0, %v47_v4, 0.0 }
   0xd   :  { %v214_v63 = vld [vmem:[#allocation2] sm:$0x1] }
  0x11   :  { %50 = vadd.xlane.f32.xlu0 %v49_v5 }
  0x7c   :  { %v67_v6 = vpop.xlane.xlu0 %66 }
  0x7d   :  { %310 = vrsqrt.f32 %v67_v6  ;;  %vm75_vm1 = vcmp.eq.f32.partialorder %v67_v6, inf  ;;  %v78_v18 = vand.u32 2147483648, %v67_v6  ;;  %vm77_vm2 = vcmp.eq.f32.partialorder %v67_v6, 0.0 }
  0x83   :  { %v311_v7 = vpop.eup %310 }
  0x84   :  { %v69_v8 = vmul.f32 %v311_v7, %v67_v6  ;;  %v51_v9 = vpop.xlane.xlu0 %50 }
  0x85   :  { %312 = vrsqrt.f32 %v51_v9  ;;  %vm59_vm3 = vcmp.eq.f32.partialorder %v51_v9, inf  ;;  %v62_v26 = vand.u32 2147483648, %v51_v9  ;;  %vm61_vm4 = vcmp.eq.f32.partialorder %v51_v9, 0.0 }
  0x86   :  { %v70_v10 = vmul.f32 %v311_v7, %v69_v8 }
  0x88   :  { %v71_v11 = vmul.f32 0.5, %v70_v10 }
  0x8a   :  { %v72_v12 = vsub.f32 1.5, %v71_v11 }
  0x8b   :  { %v313_v13 = vpop.eup %312 }
  0x8c   :  { %v73_v14 = vmul.f32 %v311_v7, %v72_v12  ;;  %v53_v15 = vmul.f32 %v313_v13, %v51_v9 }
  0x8e   :  { %v74_v16 = vmul.f32 %v73_v14, %v67_v6  ;;  %v54_v17 = vmul.f32 %v313_v13, %v53_v15  ;;  %v223_v15 = vld [vmem:[#allocation3] sm:$0x1] }
  0x90   :  { %v76_v19 = vsel %vm75_vm1, %v67_v6, %v74_v16  ;;  %v55_v20 = vmul.f32 0.5, %v54_v17  ;;  %v45_v6 = vld [vmem:[%s457_s1] sm:$0xff]  ;;  %vm40_vm1 = vcmask 0  }
  0x91   :  { %v79_v21 = vsel %vm77_vm2, %v78_v18, %v76_v19  ;;  %41 = vst.msk [vmem:[#allocation5] sm:$0x1] %vm40_vm1, %v382_v54 }
  0x92   :  { %v56_v22 = vsub.f32 1.5, %v55_v20  ;;  %v97_v23 = vmax.f32 %v79_v21, 1e-08  ;;  %42 = vst.msk [vmem:[#allocation6] sm:$0x1] %vm40_vm1, %v382_v54 }
  0x94   :  { %v57_v24 = vmul.f32 %v313_v13, %v56_v22  ;;  %314 = vrcp.f32 %v97_v23  ;;  %v109_v33 = vand.u32 2147483648, %v97_v23  ;;  %v107_v35 = vand.u32 2147483647, %v97_v23 }
  0x95   :  { %vm103_vm6 = vweird.f32 %v97_v23 }
  0x96   :  { %v58_v25 = vmul.f32 %v57_v24, %v51_v9  ;;  %v110_v38 = vor.u32 1.1754944e-38, %v109_v33  ;;  %vm108_vm8 = vcmp.eq.f32.partialorder %v107_v35, 8.507059e+37 }
  0x98   :  { %v60_v27 = vsel %vm59_vm3, %v51_v9, %v58_v25  ;;  %v309_v25 = vld [vmem:[%s459_s3] ss:$0 sm:$0xff] }
  0x99   :  { %v63_v28 = vsel %vm61_vm4, %v62_v26, %v60_v27 }
  0x9a   :  { %v315_v29 = vpop.eup %314  ;;  %v80_v30 = vmax.f32 %v63_v28, 1e-08 }
  0x9b   :  { %v99_v31 = vmul.f32 %v315_v29, %v97_v23  ;;  %vm104_vm5 = vweird.f32 %v315_v29 }
  0x9c   :  { %316 = vrcp.f32 %v80_v30  ;;  %vm105_vm7 = vmor %vm103_vm6, %vm104_vm5  ;;  %v92_v44 = vand.u32 2147483648, %v80_v30  ;;  %v90_v46 = vand.u32 2147483647, %v80_v30  ;;  %vm86_vm10 = vweird.f32 %v80_v30 }
  0x9d   :  { %v100_v32 = vsub.f32 1.0, %v99_v31 }
  0x9e   :  { %v93_v48 = vor.u32 1.1754944e-38, %v92_v44  ;;  %vm91_vm12 = vcmp.eq.f32.partialorder %v90_v46, 8.507059e+37 }
  0x9f   :  { %v101_v34 = vmul.f32 %v315_v29, %v100_v32 }
  0xa1   :  { %v102_v36 = vadd.f32 %v315_v29, %v101_v34 }
  0xa2   :  { %v317_v37 = vpop.eup %316 }
  0xa3   :  { %v106_v39 = vsel %vm105_vm7, %v315_v29, %v102_v36  ;;  %v82_v40 = vmul.f32 %v317_v37, %v80_v30  ;;  %vm87_vm9 = vweird.f32 %v317_v37 }
  0xa4   :  { %v111_v41 = vsel %vm108_vm8, %v110_v38, %v106_v39  ;;  %vm88_vm11 = vmor %vm86_vm10, %vm87_vm9 }
  0xa5   :  { %v112_v42 = vmul.f32 %v111_v41, %v44_v0  ;;  %v83_v43 = vsub.f32 1.0, %v82_v40 }
  0xa7   :  { %293 = vmatpush.xpose.msk.msra.mxu0 %vm48_vm0, %v112_v42  ;;  %v84_v45 = vmul.f32 %v317_v37, %v83_v43 }
  0xa9   :  { %v85_v47 = vadd.f32 %v317_v37, %v84_v45 }
  0xab   :  { %v89_v49 = vsel %vm88_vm11, %v317_v37, %v85_v47  ;;  %v203_v37 = vld [vmem:[#allocation4] sm:$0x1] }
  0xac   :  { %v94_v50 = vsel %vm91_vm12, %v93_v48, %v89_v49 }
  0xad   :  { %v95_v51 = vmul.f32 14.285714, %v94_v50 }
  0xaf   :  { %v96_v52 = vmul.f32 %v95_v51, %v416_v2 }
  0xb1   :  { %294 = vmatmul.msk.f32.vlgmr.msra.gmra.mxu0 %vm48_vm0, %v96_v52  ;;  %vm189_vm0 = vcmask 7168  }
 0x12e   :  { %v136_v56 = vpop.f32.mrf.mxu0 }
 0x12f   :  { %v172_v57 = vsel %vm157_vm14, %v136_v56, -inf }
 0x130   :  { %173 = vmax.xlane.f32.xlu1 %v172_v57  ;;  %v216_v58 = vrot.slane %v172_v57, 4 }
 0x132   :  { %v217_v59 = vmax.f32 %v172_v57, %v216_v58 }
 0x134   :  { %v218_v60 = vrot.slane %v217_v59, 2 }
 0x136   :  { %v219_v61 = vmax.f32 %v217_v59, %v218_v60 }
 0x138   :  { %v220_v62 = vrot.slane %v219_v61, 1 }
 0x13a   :  { %v221_v0 = vmax.f32 %v219_v61, %v220_v62  ;;  %v155_v62 = vld [vmem:[#allocation5] sm:$0x1] }
 0x13c   :  { %v222_v1 = vmax.f32 %v214_v63, %v221_v0 }
 0x13e   :  { %v229_v2 = vperm.slane %v222_v1, 0  ;;  %243 = vst.msk [vmem:[#allocation2] sm:$0x1] %vm36_vm13, %v222_v1  ;;  %v224_v5 = vsub.f32 %v214_v63, %v222_v1 }
 0x140   :  { %v231_v3 = vsub.f32 %v136_v56, %v229_v2  ;;  %v225_v7 = vmul.f32 1.442695, %v224_v5 }
 0x142   :  { %v232_v4 = vmul.f32 1.442695, %v231_v3 }
 0x144   :  { %318 = vpow2.f32 %v232_v4 }
 0x145   :  { %320 = vpow2.f32 %v225_v7  ;;  %v247_v42 = vld [vmem:[#allocation2] sm:$0x1] }
 0x149   :  { %146 = vperm.xlu1 %307, %v45_v6  }
 0x14a   :  { %v319_v8 = vpop.eup %318 }
 0x14b   :  { %v234_v9 = vsel %vm157_vm14, %v319_v8, 0.0  ;;  %v321_v14 = vpop.eup %320 }
 0x14c   :  { %v235_v10 = vrot.slane %v234_v9, 4  ;;  %v227_v18 = vmul.f32 %v321_v14, %v223_v15  ;;  %v187_v14 = vld [vmem:[#allocation6] sm:$0x1] }
 0x14e   :  { %v236_v11 = vadd.f32 %v235_v10, %v234_v9 }
 0x150   :  { %v237_v12 = vrot.slane %v236_v11, 2 }
 0x152   :  { %v238_v13 = vadd.f32 %v237_v12, %v236_v11 }
 0x154   :  { %v239_v16 = vrot.slane %v238_v13, 1 }
 0x156   :  { %v240_v17 = vadd.f32 %v239_v16, %v238_v13 }
 0x158   :  { %v241_v19 = vadd.f32 %v240_v17, %v227_v18 }
 0x15a   :  { %242 = vst.msk [vmem:[#allocation3] sm:$0x1] %vm36_vm13, %v241_v19 }
 0x161   :  { %v248_v34 = vld [vmem:[#allocation3] sm:$0x1] }
 0x1a3   :  { %v174_v20 = vpop.xlane.xlu1 %173 }
 0x1a4   :  { %v175_v21 = vsub.f32 %v136_v56, %v174_v20 }
 0x1a6   :  { %v176_v22 = vmul.f32 1.442695, %v175_v21 }
 0x1a8   :  { %322 = vpow2.f32 %v176_v22 }
 0x1a9   :  { %324 = vlog2.f32 %v248_v34 }
 0x1ae   :  { %v323_v23 = vpop.eup %322 }
 0x1af   :  { %v178_v24 = vsel %vm157_vm14, %v323_v23, 0.0  ;;  %v325_v40 = vpop.eup %324 }
 0x1b0   :  { %179 = vadd.xlane.f32.xlu2 %v178_v24  ;;  %v250_v41 = vmul.f32 0.6931472, %v325_v40 }
 0x1b2   :  { %v251_v43 = vadd.f32 %v250_v41, %v247_v42 }
 0x1bb   :  { %v147_v26 = vpop.permute.xlu1 %146 }
 0x1bc   :  { %vm149_vm15 = vcmp.eq.s32.totalorder %v147_v26, %v309_v25 }
 0x1bd   :  { %v295_v27 = vsel %vm149_vm15, 1.0, %v382_v54 }
 0x1be   :  { %v184_v28 = vsel %vm157_vm14, %v295_v27, 0.0  ;;  %v156_v29 = vmul.f32 %v295_v27, %v136_v56 }
 0x1bf   :  { %185 = vadd.xlane.f32.xlu2 %v184_v28  ;;  %v204_v30 = vrot.slane %v184_v28, 4 }
 0x1c0   :  { %v158_v31 = vsel %vm157_vm14, %v156_v29, 0.0 }
 0x1c1   :  { %v205_v32 = vadd.f32 %v204_v30, %v184_v28  ;;  %159 = vadd.xlane.f32.xlu0 %v158_v31 }
 0x1c3   :  { %v206_v33 = vrot.slane %v205_v32, 2 }
 0x1c5   :  { %v207_v35 = vadd.f32 %v206_v33, %v205_v32 }
 0x1c7   :  { %v208_v36 = vrot.slane %v207_v35, 1 }
 0x1c9   :  { %v209_v38 = vadd.f32 %v208_v36, %v207_v35 }
 0x1cb   :  { %v210_v39 = vadd.f32 %v209_v38, %v203_v37 }
 0x1cd   :  { %212 = vst.msk [vmem:[#allocation4] sm:$0x1] %vm36_vm13, %v210_v39 }
 0x1d4   :  { %v252_v44 = vld [vmem:[#allocation4] sm:$0x1] }
 0x1d5   :  { %v253_v45 = vmul.f32 %v252_v44, %v251_v43 }
 0x1d7   :  { %v254_v46 = vsel %vm36_vm13, %v253_v45, 0.0 }
 0x1d8   :  { %255 = vadd.xlane.f32.xlu0 %v254_v46 }
 0x223   :  { %v180_v47 = vpop.xlane.xlu2 %179 }
 0x224   :  { %326 = vlog2.f32 %v180_v47 }
 0x22a   :  { %v327_v48 = vpop.eup %326 }
 0x22b   :  { %v182_v49 = vmul.f32 0.6931472, %v327_v48 }
 0x22d   :  { %v183_v50 = vadd.f32 %v182_v49, %v174_v20 }
 0x232   :  { %v186_v51 = vpop.xlane.xlu2 %185 }
 0x233   :  { %v188_v52 = vmul.f32 %v186_v51, %v183_v50 }
 0x234   :  { %v160_v53 = vpop.xlane.xlu0 %159 }
 0x235   :  { %v161_v55 = vrot.slane %v160_v53, 4  ;;  %v190_v56 = vsel %vm189_vm0, %v188_v52, 0.0 }
 0x236   :  { %191 = vadd.xlane.f32.xlu2 %v190_v56 }
 0x237   :  { %v162_v57 = vadd.f32 %v161_v55, %v160_v53 }
 0x239   :  { %v163_v58 = vrot.slane %v162_v57, 2 }
 0x23b   :  { %v164_v59 = vadd.f32 %v163_v58, %v162_v57 }
 0x23d   :  { %v165_v60 = vrot.slane %v164_v59, 1 }
 0x23f   :  { %v166_v61 = vadd.f32 %v165_v60, %v164_v59 }
 0x241   :  { %296 = vpush %v166_v61 }
 0x24b   :  { %v256_v1 = vpop.xlane.xlu0 %255 }
 0x24c   :  { %v257_v2 = vrot.slane %v256_v1, 4 }
 0x24e   :  { %v258_v3 = vadd.f32 %v257_v2, %v256_v1 }
 0x250   :  { %v259_v4 = vrot.slane %v258_v3, 2 }
 0x252   :  { %v260_v7 = vadd.f32 %v259_v4, %v258_v3 }
 0x254   :  { %v261_v10 = vrot.slane %v260_v7, 1 }
 0x256   :  { %v262_v13 = vadd.f32 %v261_v10, %v260_v7 }
 0x272   :  { %s297_s3 = spop %296 }
 0x273   :  { %v168_v63 = vstv %s297_s3 }
 0x274   :  { %v169_v0 = vadd.f32 %v168_v63, %v155_v62 }
 0x276   :  { %171 = vst.msk [vmem:[#allocation5] sm:$0x1] %vm40_vm1, %v169_v0 }
 0x27d   :  { %v265_v18 = vld [vmem:[#allocation5] sm:$0x1] }
 0x2a9   :  { %v192_v54 = vpop.xlane.xlu2 %191 }
 0x2aa   :  { %v193_v5 = vrot.slane %v192_v54, 4 }
 0x2ac   :  { %v194_v6 = vadd.f32 %v193_v5, %v192_v54 }
 0x2ae   :  { %v195_v8 = vrot.slane %v194_v6, 2 }
 0x2b0   :  { %v196_v9 = vadd.f32 %v195_v8, %v194_v6 }
 0x2b2   :  { %v197_v11 = vrot.slane %v196_v9, 1 }
 0x2b4   :  { %v198_v12 = vadd.f32 %v197_v11, %v196_v9 }
 0x2b6   :  { %298 = vpush %v198_v12 }
 0x2b7   :  { %300 = vpush %v262_v13 }
 0x2e7   :  { %s299_s23 = spop %298 }
 0x2e8   :  { %v200_v15 = vstv %s299_s23  ;;  %s301_s24 = spop %300 }
 0x2e9   :  { %v201_v16 = vadd.f32 %v200_v15, %v187_v14  ;;  %v264_v17 = vstv %s301_s24 }
 0x2ea   :  { %v270_v19 = vsub.f32 %v265_v18, %v264_v17 }
 0x2eb   :  { %202 = vst.msk [vmem:[#allocation6] sm:$0x1] %vm40_vm1, %v201_v16 }
 0x2ec   :  { %v271_v22 = vsub.f32 0.0, %v270_v19 }
 0x2ee   :  { %v272_v25 = vmul.f32 0.125, %v271_v22 }
 0x2f2   :  { %v266_v20 = vld [vmem:[#allocation6] sm:$0x1] }
 0x2f3   :  { %v267_v21 = vsub.f32 %v265_v18, %v266_v20 }
 0x2f5   :  { %v268_v23 = vsub.f32 0.0, %v267_v21 }
 0x2f7   :  { %v269_v24 = vmul.f32 0.125, %v268_v23 }
 0x2f9   :  { %v273_v26 = vadd.f32 %v272_v25, %v269_v24 }
 0x2fb   :  { %v274_v27 = vmul.f32 0.5, %v273_v26 }
 0x2fd   :  { %275 = vst.msk [vmem:[#allocation10] sm:$0x1] %vm40_vm1, %v274_v27 }
 0x2fe   :  { %286 = dma.vmem_to_hbm [thread:$0]  %s282_s26, 16, %s284_s29, [#allocation9]  }
 0x2ff   :  { %378 = dma.done.wait [#allocation9], 16  }
 0x300   :  { %379 = vsyncadd [#allocation9], 4294967280 }
 0x301   :  { %291 = vsyncpa [#allocation8], 1 }
 0x302   :  { %292 = vsyncpa [#allocation9], 1 }

</bundles_post_ra>
